<compile_context>
chip_gen: v7x
topology: tpu7x:2x2x1
jax: 0.10.0
libtpu: 0.0.40
codegen_flags: <defaults>
</compile_context>

<pallas_src>
import jax
import jax.numpy as jnp
from jax import lax
from jax.experimental import pallas as pl
from jax.experimental.pallas import tpu as pltpu


def _round_up(x, m):
    return (x + m - 1) // m * m


_DEFAULT_TOKEN_TILE = 128          # primary tuning knob (rounded to sublane)
_ONEHOT_MAX_VOCAB = 2048           # use the MXU one-hot gather up to this V
_ONEHOT_MAX_ELEMS = 128 * 1024     # cap T*V of the one-hot intermediate
_MAX_TOKENS_PER_CALL = 128 * 1024  # SMEM bound for scalar-prefetched id chunks
_MAX_INFLIGHT_DMAS = 32            # bounded DMA wave size on the HBM path


def _vmem_budget_bytes():
    """Generation-aware VMEM budget (~0.75 x per-TensorCore capacity)."""
    try:
        cap = int(pltpu.get_tpu_info().vmem_capacity_bytes)
    except Exception:
        cap = 64 << 20  # conservative fallback: v7x per-TC VMEM
    return (cap * 3) // 4


# ---------------------------------------------------------------------------
# Path A1: small vocab, VMEM-resident table, one-hot matmul on the MXU.
# ---------------------------------------------------------------------------
def _onehot_gather_kernel(ids_ref, table_ref, out_ref):
    # ids_ref  : VMEM (T, 1) int32 tile of token ids
    # table_ref: VMEM (V, Dp) full resident table (single-buffered)
    # out_ref  : VMEM (T, Dp) output tile
    T = out_ref.shape[0]
    V = table_ref.shape[0]
    ids = ids_ref[...]                                       # (T, 1)
    iota = lax.broadcasted_iota(jnp.int32, (T, V), 1)
    onehot = (ids == iota).astype(table_ref.dtype)           # (T, V)
    out_ref[...] = jnp.dot(
        onehot, table_ref[...], preferred_element_type=jnp.float32
    ).astype(out_ref.dtype)


def _onehot_path(ids2d, table, T, vmem_limit):
    n = ids2d.shape[0]
    _, Dp = table.shape
    grid_spec = pltpu.PrefetchScalarGridSpec(
        num_scalar_prefetch=0,
        grid=(n // T,),
        in_specs=[
            pl.BlockSpec((T, 1), lambda i: (i, 0)),
            # Full table, resident in VMEM, single buffer (no pipelining).
            pl.BlockSpec(memory_space=pltpu.MemorySpace.VMEM),
        ],
        out_specs=pl.BlockSpec((T, Dp), lambda i: (i, 0)),
    )
    return pl.pallas_call(
        _onehot_gather_kernel,
        out_shape=jax.ShapeDtypeStruct((n, Dp), table.dtype),
        grid_spec=grid_spec,
        compiler_params=pltpu.CompilerParams(
            dimension_semantics=("parallel",),
            vmem_limit_bytes=vmem_limit,
        ),
    )(ids2d, table)


# ---------------------------------------------------------------------------
# Path A2: VMEM-resident table, per-row dynamic-slice gather, direct stores.
# ---------------------------------------------------------------------------
def _make_rowgather_kernel(T):
    def kernel(ids_ref, table_ref, out_ref):
        # ids_ref  : SMEM (N_chunk,) int32 (scalar-prefetched ids)
        # table_ref: VMEM (V, Dp) full resident table (single-buffered)
        # out_ref  : VMEM (T, Dp) output tile
        base = pl.program_id(0) * T
        for t in range(T):
            idx = ids_ref[base + t]
            # Row goes straight into the output tile -- no concatenate,
            # no XLU sublane packing, no vreg pressure.
            out_ref[pl.ds(t, 1), :] = table_ref[pl.ds(idx, 1), :]

    return kernel


def _rowgather_path(flat_ids, table, T, vmem_limit):
    n = flat_ids.shape[0]
    _, Dp = table.shape
    grid_spec = pltpu.PrefetchScalarGridSpec(
        num_scalar_prefetch=1,
        grid=(n // T,),
        in_specs=[pl.BlockSpec(memory_space=pltpu.MemorySpace.VMEM)],
        out_specs=pl.BlockSpec((T, Dp), lambda i, ids: (i, 0)),
    )
    return pl.pallas_call(
        _make_rowgather_kernel(T),
        out_shape=jax.ShapeDtypeStruct((n, Dp), table.dtype),
        grid_spec=grid_spec,
        compiler_params=pltpu.CompilerParams(
            dimension_semantics=("parallel",),
            vmem_limit_bytes=vmem_limit,
        ),
    )(flat_ids, table)


# ---------------------------------------------------------------------------
# Path B: large table in HBM, bounded waves of single-row DMAs into out_ref.
# ---------------------------------------------------------------------------
def _make_hbm_gather_kernel(T, W):
    def kernel(ids_ref, table_hbm, out_ref, sems):
        # ids_ref  : SMEM (N_chunk,) int32
        # table_hbm: HBM (V, Dp)  (memory_space=pl.ANY, no auto-DMA)
        # out_ref  : VMEM (T, Dp) pipelined output tile (DMA destination)
        # sems     : (W,) rotating DMA semaphores (bounded in-flight waves)
        base = pl.program_id(0) * T

        def start(t):
            idx = ids_ref[base + t]
            pltpu.make_async_copy(
                table_hbm.at[pl.ds(idx, 1), :],
                out_ref.at[pl.ds(t, 1), :],
                sems.at[t % W],
            ).start()

        def wait(t):
            # Descriptor only needs the matching transfer size + semaphore.
            pltpu.make_async_copy(
                table_hbm.at[pl.ds(0, 1), :],
                out_ref.at[pl.ds(t, 1), :],
                sems.at[t % W],
            ).wait()

        for t in range(min(W, T)):
            start(t)
        for t in range(T):
            wait(t)
            if t + W < T:
                start(t + W)

    return kernel


def _hbm_path(flat_ids, table, T, vmem_limit):
    n = flat_ids.shape[0]
    _, Dp = table.shape
    W = min(T, _MAX_INFLIGHT_DMAS)
    grid_spec = pltpu.PrefetchScalarGridSpec(
        num_scalar_prefetch=1,
        grid=(n // T,),
        in_specs=[pl.BlockSpec(memory_space=pl.ANY)],
        out_specs=pl.BlockSpec((T, Dp), lambda i, ids: (i, 0)),
        scratch_shapes=[pltpu.SemaphoreType.DMA((W,))],
    )
    return pl.pallas_call(
        _make_hbm_gather_kernel(T, W),
        out_shape=jax.ShapeDtypeStruct((n, Dp), table.dtype),
        grid_spec=grid_spec,
        compiler_params=pltpu.CompilerParams(
            dimension_semantics=("parallel",),
            vmem_limit_bytes=vmem_limit,
        ),
    )(flat_ids, table)


# ---------------------------------------------------------------------------
# Wrapper (EmbeddingLayer.forward)
# ---------------------------------------------------------------------------
def embedding_forward(ids, table, *, token_tile=None, force_path=None):
    """Embedding lookup.

    ids   : int array, any shape (e.g. (B, S)) of token ids
    table : float array (V, D) embedding weight (padding_idx row pre-zeroed)
    force_path: None | "onehot" | "rowgather" | "hbm" (testing/tuning)
    returns float array of shape ids.shape + (D,)
    """
    orig_shape = tuple(ids.shape)
    V, D = table.shape

    # Clamp so a bad id can never become an OOB DMA / VMEM read.
    flat_ids = jnp.clip(ids.reshape(-1).astype(jnp.int32), 0, V - 1)
    N = int(flat_ids.shape[0])

    # Lane-dense layout: pad the feature dim to a multiple of 128.
    # NOTE: in production, do this once at weight init, not per forward call.
    Dp = _round_up(D, 128)
    table_p = table if Dp == D else jnp.pad(table, ((0, 0), (0, Dp - D)))
    itemsize = table_p.dtype.itemsize

    # Token tile: multiple of sublane packing (8 for 4-byte, 16 for 2-byte
    # dtypes) so (T, Dp) output tiles store as unmasked dense vst.
    sub = 16 if itemsize == 2 else 8
    if token_tile is None:
        token_tile = _DEFAULT_TOKEN_TILE
    T = _round_up(min(token_tile, max(N, 1)), sub)

    budget = _vmem_budget_bytes()
    table_bytes = V * Dp * itemsize
    tile_bytes = T * Dp * itemsize
    # 1x resident (single-buffered) table + double-buffered out/id tiles + slack.
    resident_need = table_bytes + 2 * tile_bytes + 2 * T * 4 + (2 << 20)
    resident = resident_need <= budget

    if force_path is not None:
        path = force_path
    elif resident and V <= _ONEHOT_MAX_VOCAB:
        path = "onehot"
    elif resident:
        path = "rowgather"
    else:
        path = "hbm"

    if path == "onehot":
        # Keep the (T, V) one-hot intermediate modest.
        max_t = max(sub, (_ONEHOT_MAX_ELEMS // max(V, 1)) // sub * sub)
        T = min(T, max_t)
        n_pad = _round_up(N, T)
        ids2d = flat_ids
        if n_pad != N:
            ids2d = jnp.pad(ids2d, (0, n_pad - N))
        ids2d = ids2d.reshape(n_pad, 1)
        out = _onehot_path(ids2d, table_p, T, budget)[:N]
    else:
        path_fn = _rowgather_path if path == "rowgather" else _hbm_path
        vmem_limit = budget if path == "rowgather" else (32 << 20)
        outs = []
        # Chunk only so the scalar-prefetched id vector stays bounded in SMEM
        # (a single chunk covers up to 128K tokens -> usually one call).
        for start in range(0, N, _MAX_TOKENS_PER_CALL):
            chunk = flat_ids[start:start + _MAX_TOKENS_PER_CALL]
            n = chunk.shape[0]
            n_pad = _round_up(n, T)
            if n_pad != n:
                chunk = jnp.pad(chunk, (0, n_pad - n))
            outs.append(path_fn(chunk, table_p, T, vmem_limit)[:n])
        out = outs[0] if len(outs) == 1 else jnp.concatenate(outs, axis=0)

    if Dp != D:
        out = out[:, :D]
    return out.reshape(*orig_shape, D)


if __name__ == "__main__":
    # Small, deterministic configuration consistent with the module.
    vocab_size = 64
    dim_model = 128
    batch, seq = 2, 8
    padding_idx = 0          # exercise the padding_idx path

    key = jax.random.PRNGKey(0)
    k_w, k_x = jax.random.split(key)

    # torch.nn.Embedding init: weight ~ N(0, 1); padding_idx row zeroed.
    table = jax.random.normal(k_w, (vocab_size, dim_model), dtype=jnp.float32)
    if padding_idx is not None:
        table = table.at[padding_idx].set(0.0)

    ids = jax.random.randint(k_x, (batch, seq), 0, vocab_size, dtype=jnp.int32)

    # Pure-JAX reference.
    ref = jnp.take(table, ids.reshape(-1), axis=0).reshape(batch, seq, dim_model)

    # Auto path: small vocab -> one-hot MXU gather with VMEM-resident table.
    out = jax.block_until_ready(embedding_forward(ids, table))
    assert out.shape == (batch, seq, dim_model), out.shape
    assert out.dtype == table.dtype
    assert jnp.allclose(out, ref), "one-hot path mismatch vs reference gather"

    # Row-gather path: per-row dynamic-slice loads from the resident table.
    out_rg = jax.block_until_ready(
        embedding_forward(ids, table, force_path="rowgather"))
    assert jnp.allclose(out_rg, ref), "row-gather path mismatch vs reference"

    # HBM path: bounded waves of per-row DMAs straight into the output tile.
    out_hbm = jax.block_until_ready(
        embedding_forward(ids, table, force_path="hbm"))
    assert jnp.allclose(out_hbm, ref), "HBM path mismatch vs reference"

    print("KERNEL_OK")
</pallas_src>

<mosaic_0001>
module attributes {stable_mosaic.version = 11 : i64} {
  func.func @_onehot_gather_kernel(%arg0: i32, %arg1: memref<16x1xi32, #tpu.memory_space<vmem>>, %arg2: memref<64x128xf32, #tpu.memory_space<vmem>>, %arg3: memref<16x128xf32, #tpu.memory_space<vmem>>) attributes {dimension_semantics = [#tpu.dimension_semantics<parallel>], iteration_bounds = array<i64: 1>, scalar_prefetch = 0 : i64, scratch_operands = 0 : i64, tpu.core_type = #tpu.core_type<tc>, window_params = [{transform_indices = @transform_0, window_bounds = array<i64: 16, 1>}, {pipeline_mode = #tpu.pipeline_mode<synchronous>, transform_indices = @transform_1, window_bounds = array<i64: 64, 128>}, {transform_indices = @transform_2, window_bounds = array<i64: 16, 128>}]} {
    %c0 = arith.constant 0 : index
    %c0_0 = arith.constant 0 : index
    %0 = vector.load %arg1[%c0, %c0_0] : memref<16x1xi32, #tpu.memory_space<vmem>>, vector<16x1xi32>
    %1 = tpu.iota {dimensions = array<i32: 1>} : vector<16x64xi32>
    %2 = vector.broadcast %0 : vector<16x1xi32> to vector<16x64xi32>
    %3 = arith.cmpi eq, %2, %1 : vector<16x64xi32>
    %4 = arith.extui %3 : vector<16x64xi1> to vector<16x64xi32>
    %5 = arith.sitofp %4 : vector<16x64xi32> to vector<16x64xf32>
    %c0_1 = arith.constant 0 : index
    %c0_2 = arith.constant 0 : index
    %6 = vector.load %arg2[%c0_1, %c0_2] : memref<64x128xf32, #tpu.memory_space<vmem>>, vector<64x128xf32>
    %cst = arith.constant dense<0.000000e+00> : vector<16x128xf32>
    %7 = tpu.matmul %5, %6, %cst {dimension_numbers = #tpu.dot_dimension_numbers<[1], [0], [0], [1], [0, 0, 1, 1], [], []>} : vector<16x64xf32>, vector<64x128xf32>, vector<16x128xf32> -> vector<16x128xf32>
    %c0_3 = arith.constant 0 : index
    %c0_4 = arith.constant 0 : index
    %8 = vector.load %arg3[%c0_3, %c0_4] : memref<16x128xf32, #tpu.memory_space<vmem>>, vector<16x128xf32>
    tpu.vector_store %arg3[%c0_3, %c0_4], %7 {strides = array<i32>} : memref<16x128xf32, #tpu.memory_space<vmem>>, vector<16x128xf32>,
    return
  }
  func.func @transform_0(%arg0: i32) -> (i32, i32) {
    %c0_i32 = arith.constant 0 : i32
    %c0_i32_0 = arith.constant 0 : i32
    return %arg0, %c0_i32 : i32, i32
  }
  func.func @transform_1(%arg0: i32) -> (i32, i32) {
    %c0_i32 = arith.constant 0 : i32
    %c0_i32_0 = arith.constant 0 : i32
    %c0_i32_1 = arith.constant 0 : i32
    return %c0_i32, %c0_i32_0 : i32, i32
  }
  func.func @transform_2(%arg0: i32) -> (i32, i32) {
    %c0_i32 = arith.constant 0 : i32
    %c0_i32_0 = arith.constant 0 : i32
    return %arg0, %c0_i32 : i32, i32
  }
}

</mosaic_0001>

<bundles_post_ra>
// kernel: tpu_custom_call.1
= control target key start
LH: loop header
LB: loop body
LE: loop exit
PB: predicated region body
PF: predicated region fallthrough
CT: control target
= control target key end

     0   :  { %7 = vsyncpa [#allocation3], 0  ;;  %s312_s0 = inlined_call_operand.vmem [shape: s32[16,1], index: 0, kind: input, shape index: {}]   ;;  %s313_s1 = inlined_call_operand.hbm [shape: f32[64,128], index: 1, kind: input, shape index: {}]   ;;  %s314_s2 = inlined_call_operand.hbm [shape: f32[16,128], index: 2, kind: output, shape index: {}]  }
   0x1   :  { %8 = vsyncpa [#allocation4], 0  ;;  %s255_s9 = smov [#allocation2]   ;;  %s207_s13 = scalar_lea.hbm %s313_s1, 1024 }
   0x2   :  { %s16_s10 = sshll.u32 %s255_s9, 4  ;;  %p208_p0 = scmp.ne.s32.totalorder %s313_s1, %s207_s13  ;;  %s17_s10 = int_to_ptr.vmem [resolvable:$true] %s16_s10 }
   0x3   :  { %p211_p1 = scmp.lt.u32.totalorder %s207_s13, %s313_s1 }
   0x5   :  { %p213_p2 = pnand %p211_p1, %p208_p0 }
   0x7   :  { %216 = shalt.err (!%p213_p2)
}
   0x8   :  { %s217_s18 = scalar_lea.vmem %s17_s10, 1024  ;;  %p222_p4 = scmp.lt.s32.totalorder %s17_s10, %s17_s10 }
   0x9   :  { %p218_p3 = scmp.ne.s32.totalorder %s17_s10, %s217_s18  ;;  %p223_p5 = scmp.lt.s32.totalorder %s217_s18, %s217_s18 }
   0xb   :  { %p224_p6 = por %p223_p5, %p222_p4 }
   0xd   :  { %p225_p7 = pnand %p224_p6, %p218_p3 }
   0xf   :  { %228 = shalt.err (!%p225_p7)
}
  0x10   :  { %s256_s19 = smov 128   ;;  %s257_s20 = smov 8  }
  0x11   :  { %22 = dma.hbm_to_vmem [thread:$0]  %s313_s1, 1024, %s17_s10, [#allocation3], %s256_s19, %s256_s19, %s257_s20  }
  0x12   :  { %251 = dma.done.wait [#allocation3], 1024  }
  0x13   :  { %252 = vsyncadd [#allocation3], 4294966272  ;;  %v258_v0 = vmov 0   ;;  %v26_v1 = vld [vmem:[%s312_s0] sm:$0xff]  ;;  %v43_v3 = vld [vmem:[#allocation2 + $0x8] sm:$0xff]  ;;  %v28_v15 = vlaneseq  ;;  %vm50_vm0 = vcmask 523264  }
  0x14   :  { %206 = vset.pattern.permute.xlu0 %v258_v0  ;;  %v42_v2 = vld [vmem:[#allocation2] sm:$0xff]  ;;  %v44_v4 = vld [vmem:[#allocation2 + $0x10] sm:$0xff]  ;;  %v45_v5 = vld [vmem:[#allocation2 + $0x18] sm:$0xff]  ;;  %v259_v18 = vmov 0.0  }
  0x15   :  { %31 = vperm.xlu0 %206, %v26_v1   ;;  %v27_v6 = vld [vmem:[%s312_s0 + $0x8] sm:$0xff]  ;;  %v184_v7 = vpack.c.bf16 %v43_v3, %v42_v2  ;;  %v188_v8 = vpack.c.bf16 %v45_v5, %v44_v4  ;;  %v46_v9 = vld [vmem:[#allocation2 + $0x20] sm:$0xff]  ;;  %v48_v12 = vld [vmem:[#allocation2 + $0x30] sm:$0xff]  ;;  %v29_v16 = vand.u32 127, %v28_v15  ;;  %s260_s0 = smov [#allocation5]  }
  0x16   :  { %v47_v10 = vld [vmem:[#allocation2 + $0x28] sm:$0xff]  ;;  %v49_v13 = vld [vmem:[#allocation2 + $0x38] sm:$0xff]  ;;  %s139_s1 = sshll.u32 %s260_s0, 4  ;;  %s140_s1 = int_to_ptr.vmem [resolvable:$true] %s139_s1 }
  0x17   :  { %185 = vmatprep.subr.bf16.mxu0 %v184_v7  ;;  %v192_v11 = vpack.c.bf16 %v47_v10, %v46_v9  ;;  %v196_v14 = vpack.c.bf16 %v49_v13, %v48_v12  ;;  %s229_s27 = scalar_lea.vmem %s140_s1, 256  ;;  %p234_p9 = scmp.lt.s32.totalorder %s140_s1, %s140_s1 }
  0x18   :  { %187 = vmatpush3.bf16.msra.mxu0 %v184_v7  ;;  %p230_p8 = scmp.ne.s32.totalorder %s140_s1, %s229_s27  ;;  %p235_p10 = scmp.lt.s32.totalorder %s229_s27, %s229_s27 }
  0x19   :  { %34 = vperm.xlu0 %206, %v27_v6   ;;  %189 = vmatprep.subr.bf16.mxu0 %v188_v8 }
  0x1a   :  { %p236_p11 = por %p235_p10, %p234_p9 }
  0x1c   :  { %191 = vmatpush3.bf16.msra.mxu0 %v188_v8  ;;  %p237_p12 = pnand %p236_p11, %p230_p8 }
  0x1d   :  { %193 = vmatprep.subr.bf16.mxu0 %v192_v11 }
  0x20   :  { %195 = vmatpush3.bf16.msra.mxu0 %v192_v11 }
  0x21   :  { %197 = vmatprep.subr.bf16.mxu0 %v196_v14 }
  0x24   :  { %199 = vmatpush3.bf16.msra.mxu0 %v196_v14 }
  0x94   :  { %v32_v17 = vpop.permute.xlu0 %31 }
  0x95   :  { %vm36_vm1 = vcmp.eq.s32.totalorder %v32_v17, %v29_v16 }
  0x96   :  { %v151_v19 = vsel %vm36_vm1, 1.0, %v259_v18 }
  0x97   :  { %181 = vmatprep.mubr.msk.f32.mxu0 %vm50_vm0, %v151_v19 }
  0x98   :  { %v35_v20 = vpop.permute.xlu0 %34 }
  0x99   :  { %vm37_vm2 = vcmp.eq.s32.totalorder %v35_v20, %v29_v16 }
  0x9a   :  { %v152_v21 = vsel %vm37_vm2, 1.0, %v259_v18 }
  0x9b   :  { %182 = vmatmul.mubr.msk.f32.vlgmr.msra.gmra.mrb[0].mxu0 %vm50_vm0, %v152_v21 }
 0x16e   :  { %v183_v22 = vpop.f32.mrb[0].mxu0 }
 0x16f   :  { %133 = vst [vmem:[#allocation5 + $0x8] sm:$0xff] %v183_v22  ;;  %v123_v23 = vpop.f32.mrb[1].mxu0 }
 0x170   :  { %132 = vst [vmem:[#allocation5] sm:$0xff] %v123_v23 }
 0x171   :  { %240 = shalt.err (!%p237_p12)
}
 0x172   :  { %s241_s30 = scalar_lea.hbm %s314_s2, 256 }
 0x173   :  { %p242_p13 = scmp.ne.s32.totalorder %s314_s2, %s241_s30  ;;  %p245_p0 = scmp.lt.u32.totalorder %s241_s30, %s314_s2 }
 0x175   :  { %p247_p1 = pnand %p245_p0, %p242_p13 }
 0x177   :  { %250 = shalt.err (!%p247_p1)
}
 0x178   :  { %145 = dma.vmem_to_hbm [thread:$0]  %s140_s1, 256, %s314_s2, [#allocation4], %s256_s19, %s256_s19, %s257_s20  }
 0x179   :  { %253 = dma.done.wait [#allocation4], 256  }
 0x17a   :  { %254 = vsyncadd [#allocation4], 4294967040 }
 0x17b   :  { %149 = vsyncpa [#allocation3], 1 }
 0x17c   :  { %150 = vsyncpa [#allocation4], 1 }

</bundles_post_ra>
